<compile_context>
chip_gen: v6e
topology: v6e:2x2x1
jax: 0.10.0
libtpu: 0.0.40
codegen_flags: <defaults>
</compile_context>

<pallas_src>
import functools

import jax
import jax.numpy as jnp
from jax.experimental import pallas as pl
from jax.experimental.pallas import tpu as pltpu


def _round_up(x, m):
    return (x + m - 1) // m * m


# ---------------------------------------------------------------------------
# Pallas kernel: full transformer block for a batch-block of B sequences.
# ---------------------------------------------------------------------------
def transformer_kernel(x_ref, wqkv_ref, bqkv_ref, wproj_ref, hvec_ref,
                       wff1_ref, bff1_ref, wff2_ref, wfin_ref, bfin_ref,
                       out_ref, *, d_pad, num_heads):
    B, T, H = x_ref.shape
    nh, DP = num_heads, d_pad
    hd = nh * DP

    x = x_ref[...].reshape(B * T, H)                        # (B*T, H) f32 slab
    x_bf = x.astype(jnp.bfloat16)

    # --- fused Q/K/V projection (one MXU dot); 1/sqrt(dim_k) pre-folded into
    #     the q columns.  Column layout: [q1..qn | k1..kn | v1..vn], each head
    #     segment in its own 128-lane block (zero padded), so all slices below
    #     are lane-tile aligned.
    qkv = jnp.dot(x_bf, wqkv_ref[...],
                  preferred_element_type=jnp.float32) + bqkv_ref[0]
    qkv = qkv.astype(jnp.bfloat16)                          # MXU operands

    def heads_to_batch(col0):
        # nh lane-aligned (B*T, DP) blocks starting at col0, stacked onto the
        # einsum batch axis -> (nh*B, T, DP).
        return jnp.concatenate(
            [qkv[:, col0 + h * DP: col0 + (h + 1) * DP].reshape(B, T, DP)
             for h in range(nh)], axis=0)

    q = heads_to_batch(0)
    k = heads_to_batch(hd)
    v = heads_to_batch(2 * hd)

    # --- one batched score einsum for ALL heads (padded lanes are zero, so the
    #     contraction over DP equals the true dq contraction).
    s = jnp.einsum("ztd,zsd->zts", q, k,
                   preferred_element_type=jnp.float32)      # (nh*B, T, T) f32
    s = s - jnp.max(s, axis=-1, keepdims=True)              # stable softmax
    e = jnp.exp(s)
    w = e * pl.reciprocal(jnp.sum(e, axis=-1, keepdims=True), approx=True)
    attn = jnp.einsum("zts,zsd->ztd", w.astype(jnp.bfloat16), v,
                      preferred_element_type=jnp.float32)   # (nh*B, T, DP)

    # --- rejoin heads on the lane axis (128-aligned blocks) -> single
    #     projection dot; padded attn lanes meet zero wproj rows.
    heads = jnp.concatenate(
        [attn[h * B:(h + 1) * B].reshape(B * T, DP) for h in range(nh)],
        axis=-1).astype(jnp.bfloat16)                       # (B*T, nh*DP)

    # Packed (1, H) vectors: [bproj, ln_gamma, ln_beta, bff2]
    bproj, ln_g, ln_b, bff2 = (hvec_ref[0], hvec_ref[1],
                               hvec_ref[2], hvec_ref[3])

    proj = jnp.dot(heads, wproj_ref[...],
                   preferred_element_type=jnp.float32) + bproj

    def layer_norm(y):  # PyTorch LayerNorm: biased variance, eps=1e-5 (f32)
        mu = jnp.mean(y, axis=-1, keepdims=True)
        var = jnp.mean(jnp.square(y - mu), axis=-1, keepdims=True)
        return (y - mu) * jax.lax.rsqrt(var + 1e-5) * ln_g + ln_b

    hdn = layer_norm(proj + x)                              # (B*T, H) f32

    ff = jnp.dot(hdn.astype(jnp.bfloat16), wff1_ref[...],
                 preferred_element_type=jnp.float32) + bff1_ref[0]
    ff = jnp.maximum(ff, 0.0)
    ff = jnp.dot(ff.astype(jnp.bfloat16), wff2_ref[...],
                 preferred_element_type=jnp.float32) + bff2
    h2 = layer_norm(ff + hdn)        # module reuses the same norm_mh params

    out = jnp.dot(h2.astype(jnp.bfloat16), wfin_ref[...],
                  preferred_element_type=jnp.float32) + bfin_ref[0]
    out_ref[...] = out.reshape(B, T, out_ref.shape[-1])     # lane-dense store


# ---------------------------------------------------------------------------
# Wrapper: embedding glue, host-side weight fusion/padding + pallas_call.
# ---------------------------------------------------------------------------
def transformer_forward(tokens, params, *, dim_k, dim_q, dim_v, num_heads=2,
                        batch_block=None):
    # embed(): word embedding lookup + positional embedding (plain-JAX glue;
    # data-dependent gather stays outside the kernel).
    emb = params["emb"][tokens] + params["pos"][: tokens.shape[1]][None, :, :]
    emb = emb.astype(jnp.float32)
    N, T, H = emb.shape
    V_out = params["wfin"].shape[1]
    assert dim_q == dim_k, "q @ k^T requires dim_q == dim_k"

    if batch_block is None:
        # One big step (grid=1) on v5e/v6e-style single-TC execution; two large
        # parallel steps only if each still keeps >=128-row matmul slabs (v7x).
        batch_block = N // 2 if (N % 2 == 0 and (N // 2) * T >= 128) else N
    B = batch_block
    assert N % B == 0, "batch must be divisible by batch_block"
    assert (B * T) % 8 == 0, "B*T must be sublane-aligned for free reshapes"
    nb = N // B

    DP = _round_up(max(dim_q, dim_k, dim_v), 128)   # per-head 128-lane block
    inv_sqrt_dk = float(dim_k) ** -0.5

    def pad_cols(a, width):
        return jnp.pad(a, ((0, 0), (0, width - a.shape[1])))

    # Fused QKV weight/bias, grouped [q1..qn | k1..kn | v1..vn]; every head
    # segment zero-padded to its own 128-lane block so in-kernel slices are
    # lane-aligned.  1/sqrt(dim_k) folded into the q columns.
    wq = [pad_cols(params[f"wq{i}"] * inv_sqrt_dk, DP) for i in range(1, num_heads + 1)]
    wk = [pad_cols(params[f"wk{i}"], DP) for i in range(1, num_heads + 1)]
    wv = [pad_cols(params[f"wv{i}"], DP) for i in range(1, num_heads + 1)]
    bq = [pad_cols(params[f"bq{i}"] * inv_sqrt_dk, DP) for i in range(1, num_heads + 1)]
    bk = [pad_cols(params[f"bk{i}"], DP) for i in range(1, num_heads + 1)]
    bv = [pad_cols(params[f"bv{i}"], DP) for i in range(1, num_heads + 1)]
    wqkv = jnp.concatenate(wq + wk + wv, axis=1).astype(jnp.bfloat16)
    bqkv = jnp.concatenate(bq + bk + bv, axis=1)            # stays f32

    # Head projection with zero rows matching the padded attention lanes.
    wproj = jnp.concatenate(
        [jnp.pad(params["wproj"][h * dim_v:(h + 1) * dim_v, :],
                 ((0, DP - dim_v), (0, 0))) for h in range(num_heads)],
        axis=0).astype(jnp.bfloat16)                        # (nh*DP, H)

    # Lane-pad the final projection so output stores are unmasked full-lane.
    V_pad = _round_up(V_out, 128)
    wfin = jnp.pad(params["wfin"], ((0, 0), (0, V_pad - V_out))).astype(jnp.bfloat16)
    bfin = jnp.pad(params["bfin"], ((0, 0), (0, V_pad - V_out)))

    # Pack the small (1, H) vectors into one array: [bproj, ln_g, ln_b, bff2].
    hvec = jnp.concatenate([params["bproj"], params["ln_g"],
                            params["ln_b"], params["bff2"]], axis=0)

    wff1 = params["wff1"].astype(jnp.bfloat16)
    wff2 = params["wff2"].astype(jnp.bfloat16)

    param_arrays = [wqkv, bqkv, wproj, hvec,
                    wff1, params["bff1"], wff2, wfin, bfin]

    def full_spec(a):
        return pl.BlockSpec(a.shape, lambda i, _nd=a.ndim: (0,) * _nd)

    kernel = functools.partial(transformer_kernel, d_pad=DP,
                               num_heads=num_heads)
    out = pl.pallas_call(
        kernel,
        out_shape=jax.ShapeDtypeStruct((N, T, V_pad), jnp.float32),
        grid_spec=pltpu.PrefetchScalarGridSpec(
            num_scalar_prefetch=0,
            grid=(nb,),
            in_specs=[pl.BlockSpec((B, T, H), lambda i: (i, 0, 0))]
                     + [full_spec(a) for a in param_arrays],
            out_specs=pl.BlockSpec((B, T, V_pad), lambda i: (i, 0, 0)),
        ),
        compiler_params=pltpu.CompilerParams(
            dimension_semantics=("parallel",),
            vmem_limit_bytes=64 * 1024 * 1024),
    )(emb, *param_arrays)
    return out[:, :, :V_out]


# ---------------------------------------------------------------------------
# Deterministic parameter init (synthetic, shapes mirror the PyTorch module)
# ---------------------------------------------------------------------------
def make_params(key, *, vocab, out_vocab, H, dk, dv, dq, F, max_length):
    keys = iter(jax.random.split(key, 32))

    def lin_init(shape, fan_in):
        bound = 1.0 / jnp.sqrt(jnp.float32(fan_in))
        return jax.random.uniform(next(keys), shape, jnp.float32, -bound, bound)

    p = {}
    p["emb"] = jax.random.normal(next(keys), (vocab, H), jnp.float32)
    p["pos"] = jax.random.normal(next(keys), (max_length, H), jnp.float32)
    for name, dout in [("k1", dk), ("v1", dv), ("q1", dq),
                       ("k2", dk), ("v2", dv), ("q2", dq)]:
        p["w" + name] = lin_init((H, dout), H)
        p["b" + name] = lin_init((1, dout), H)
    p["wproj"] = lin_init((2 * dv, H), 2 * dv)
    p["bproj"] = lin_init((1, H), 2 * dv)
    p["ln_g"] = jnp.ones((1, H), jnp.float32)
    p["ln_b"] = jnp.zeros((1, H), jnp.float32)
    p["wff1"] = lin_init((H, F), H)
    p["bff1"] = lin_init((1, F), H)
    p["wff2"] = lin_init((F, H), F)
    p["bff2"] = lin_init((1, H), F)
    p["wfin"] = lin_init((H, out_vocab), H)
    p["bfin"] = lin_init((1, out_vocab), H)
    return p


# ---------------------------------------------------------------------------
# Pure-JAX f32 reference (semantics of the PyTorch forward) for validation
# ---------------------------------------------------------------------------
def reference_forward(tokens, p, *, dim_k):
    x = p["emb"][tokens] + p["pos"][: tokens.shape[1]][None]

    def ln(y):
        mu = y.mean(-1, keepdims=True)
        var = ((y - mu) ** 2).mean(-1, keepdims=True)
        return (y - mu) / jnp.sqrt(var + 1e-5) * p["ln_g"][0] + p["ln_b"][0]

    def head(i):
        k = x @ p[f"wk{i}"] + p[f"bk{i}"][0]
        v = x @ p[f"wv{i}"] + p[f"bv{i}"][0]
        q = x @ p[f"wq{i}"] + p[f"bq{i}"][0]
        s = jnp.einsum("ntd,nsd->nts", q, k) / jnp.sqrt(jnp.float32(dim_k))
        w = jax.nn.softmax(s, axis=-1)
        return jnp.einsum("nts,nsd->ntd", w, v)

    heads = jnp.concatenate([head(1), head(2)], axis=-1)
    proj = heads @ p["wproj"] + p["bproj"][0]
    h = ln(proj + x)
    ff = jax.nn.relu(h @ p["wff1"] + p["bff1"][0]) @ p["wff2"] + p["bff2"][0]
    h2 = ln(ff + h)
    return h2 @ p["wfin"] + p["bfin"][0]


if __name__ == "__main__":
    # Small shapes consistent with the module's forward: (N, T) int tokens.
    N, T, H = 4, 8, 32
    dk = dv = dq = 16
    F = 64                      # dim_feedforward (scaled down)
    vocab, out_vocab, max_length = 50, 24, 43

    key = jax.random.PRNGKey(0)
    kp, kt = jax.random.split(key)
    params = make_params(kp, vocab=vocab, out_vocab=out_vocab, H=H,
                         dk=dk, dv=dv, dq=dq, F=F, max_length=max_length)
    tokens = jax.random.randint(kt, (N, T), 0, vocab, dtype=jnp.int32)

    # batch_block=None -> auto: one big grid step here (N*T=32 rows is far too
    # small to split without re-introducing per-step overhead).
    out = transformer_forward(tokens, params, dim_k=dk, dim_q=dq, dim_v=dv,
                              num_heads=2)
    out = jax.block_until_ready(out)

    ref = reference_forward(tokens, params, dim_k=dk)
    assert out.shape == (N, T, out_vocab), out.shape
    # bf16 MXU operands + approx softmax reciprocal (f32 accumulation) ->
    # relaxed tolerance vs the pure-f32 reference.
    assert jnp.allclose(out, ref, atol=1e-1, rtol=1e-1), "mismatch vs reference"
    print("KERNEL_OK")
</pallas_src>

<mosaic_0001>
module attributes {stable_mosaic.version = 11 : i64} {
  func.func @transformer_kernel(%arg0: i32, %arg1: memref<4x8x32xf32, #tpu.memory_space<vmem>>, %arg2: memref<32x768xbf16, #tpu.memory_space<vmem>>, %arg3: memref<1x768xf32, #tpu.memory_space<vmem>>, %arg4: memref<256x32xbf16, #tpu.memory_space<vmem>>, %arg5: memref<4x32xf32, #tpu.memory_space<vmem>>, %arg6: memref<32x64xbf16, #tpu.memory_space<vmem>>, %arg7: memref<1x64xf32, #tpu.memory_space<vmem>>, %arg8: memref<64x32xbf16, #tpu.memory_space<vmem>>, %arg9: memref<32x128xbf16, #tpu.memory_space<vmem>>, %arg10: memref<1x128xf32, #tpu.memory_space<vmem>>, %arg11: memref<4x8x128xf32, #tpu.memory_space<vmem>>) attributes {dimension_semantics = [#tpu.dimension_semantics<parallel>], iteration_bounds = array<i64: 1>, scalar_prefetch = 0 : i64, scratch_operands = 0 : i64, tpu.core_type = #tpu.core_type<tc>, window_params = [{transform_indices = @transform_0, window_bounds = array<i64: 4, 8, 32>}, {pipeline_mode = #tpu.pipeline_mode<synchronous>, transform_indices = @transform_1, window_bounds = array<i64: 32, 768>}, {pipeline_mode = #tpu.pipeline_mode<synchronous>, transform_indices = @transform_2, window_bounds = array<i64: 1, 768>}, {pipeline_mode = #tpu.pipeline_mode<synchronous>, transform_indices = @transform_3, window_bounds = array<i64: 256, 32>}, {pipeline_mode = #tpu.pipeline_mode<synchronous>, transform_indices = @transform_4, window_bounds = array<i64: 4, 32>}, {pipeline_mode = #tpu.pipeline_mode<synchronous>, transform_indices = @transform_5, window_bounds = array<i64: 32, 64>}, {pipeline_mode = #tpu.pipeline_mode<synchronous>, transform_indices = @transform_6, window_bounds = array<i64: 1, 64>}, {pipeline_mode = #tpu.pipeline_mode<synchronous>, transform_indices = @transform_7, window_bounds = array<i64: 64, 32>}, {pipeline_mode = #tpu.pipeline_mode<synchronous>, transform_indices = @transform_8, window_bounds = array<i64: 32, 128>}, {pipeline_mode = #tpu.pipeline_mode<synchronous>, transform_indices = @transform_9, window_bounds = array<i64: 1, 128>}, {transform_indices = @transform_10, window_bounds = array<i64: 4, 8, 128>}]} {
    %c0 = arith.constant 0 : index
    %c0_0 = arith.constant 0 : index
    %c0_1 = arith.constant 0 : index
    %0 = vector.load %arg1[%c0, %c0_0, %c0_1] : memref<4x8x32xf32, #tpu.memory_space<vmem>>, vector<4x8x32xf32>
    %1 = vector.shape_cast %0 : vector<4x8x32xf32> to vector<32x32xf32>
    %2 = arith.truncf %1 : vector<32x32xf32> to vector<32x32xbf16>
    %c0_2 = arith.constant 0 : index
    %c0_3 = arith.constant 0 : index
    %3 = vector.load %arg2[%c0_2, %c0_3] : memref<32x768xbf16, #tpu.memory_space<vmem>>, vector<32x768xbf16>
    %cst = arith.constant dense<0.000000e+00> : vector<32x768xf32>
    %4 = tpu.matmul %2, %3, %cst {dimension_numbers = #tpu.dot_dimension_numbers<[1], [0], [0], [1], [0, 0, 1, 1], [], []>} : vector<32x32xbf16>, vector<32x768xbf16>, vector<32x768xf32> -> vector<32x768xf32>
    %c0_4 = arith.constant 0 : index
    %c0_5 = arith.constant 0 : index
    %5 = vector.load %arg3[%c0_4, %c0_5] : memref<1x768xf32, #tpu.memory_space<vmem>>, vector<1x768xf32>
    %6 = vector.shape_cast %5 : vector<1x768xf32> to vector<768xf32>
    %7 = vector.shape_cast %6 : vector<768xf32> to vector<1x768xf32>
    %8 = vector.broadcast %7 : vector<1x768xf32> to vector<32x768xf32>
    %9 = arith.addf %4, %8 : vector<32x768xf32>
    %10 = arith.truncf %9 : vector<32x768xf32> to vector<32x768xbf16>
    %11 = vector.extract_strided_slice %10 {offsets = [0, 0], sizes = [32, 128], strides = [1, 1]} : vector<32x768xbf16> to vector<32x128xbf16>
    %12 = vector.shape_cast %11 : vector<32x128xbf16> to vector<4x8x128xbf16>
    %13 = vector.extract_strided_slice %10 {offsets = [0, 128], sizes = [32, 128], strides = [1, 1]} : vector<32x768xbf16> to vector<32x128xbf16>
    %14 = vector.shape_cast %13 : vector<32x128xbf16> to vector<4x8x128xbf16>
    %15 = tpu.concatenate %12, %14 in 0 : vector<4x8x128xbf16>, vector<4x8x128xbf16> -> vector<8x8x128xbf16>
    %16 = vector.extract_strided_slice %10 {offsets = [0, 256], sizes = [32, 128], strides = [1, 1]} : vector<32x768xbf16> to vector<32x128xbf16>
    %17 = vector.shape_cast %16 : vector<32x128xbf16> to vector<4x8x128xbf16>
    %18 = vector.extract_strided_slice %10 {offsets = [0, 384], sizes = [32, 128], strides = [1, 1]} : vector<32x768xbf16> to vector<32x128xbf16>
    %19 = vector.shape_cast %18 : vector<32x128xbf16> to vector<4x8x128xbf16>
    %20 = tpu.concatenate %17, %19 in 0 : vector<4x8x128xbf16>, vector<4x8x128xbf16> -> vector<8x8x128xbf16>
    %21 = vector.extract_strided_slice %10 {offsets = [0, 512], sizes = [32, 128], strides = [1, 1]} : vector<32x768xbf16> to vector<32x128xbf16>
    %22 = vector.shape_cast %21 : vector<32x128xbf16> to vector<4x8x128xbf16>
    %23 = vector.extract_strided_slice %10 {offsets = [0, 640], sizes = [32, 128], strides = [1, 1]} : vector<32x768xbf16> to vector<32x128xbf16>
    %24 = vector.shape_cast %23 : vector<32x128xbf16> to vector<4x8x128xbf16>
    %25 = tpu.concatenate %22, %24 in 0 : vector<4x8x128xbf16>, vector<4x8x128xbf16> -> vector<8x8x128xbf16>
    "tpu.trace_start"() <{level = 10 : i32, message = "ztd,zsd->zts"}> : () -> ()
    %cst_6 = arith.constant dense<0.000000e+00> : vector<8x8x8xf32>
    %26 = tpu.matmul %15, %20, %cst_6 {dimension_numbers = #tpu.dot_dimension_numbers<[2], [2], [1], [1], [0, 0, 0, 1, 1, 1], [0], [0]>} : vector<8x8x128xbf16>, vector<8x8x128xbf16>, vector<8x8x8xf32> -> vector<8x8x8xf32>
    "tpu.trace_stop"() : () -> ()
    %cst_7 = arith.constant dense<0xFF800000> : vector<8x8xf32>
    %27 = vector.multi_reduction <maximumf>, %26, %cst_7 [2] : vector<8x8x8xf32> to vector<8x8xf32>
    %28 = vector.shape_cast %27 : vector<8x8xf32> to vector<8x8x1xf32>
    %29 = vector.broadcast %28 : vector<8x8x1xf32> to vector<8x8x8xf32>
    %30 = arith.subf %26, %29 : vector<8x8x8xf32>
    %31 = math.exp %30 : vector<8x8x8xf32>
    %cst_8 = arith.constant dense<0.000000e+00> : vector<8x8xf32>
    %32 = vector.multi_reduction <add>, %31, %cst_8 [2] : vector<8x8x8xf32> to vector<8x8xf32>
    %33 = vector.shape_cast %32 : vector<8x8xf32> to vector<8x8x1xf32>
    %34 = tpu.reciprocal %33 {approx = true} : vector<8x8x1xf32> -> vector<8x8x1xf32>
    %35 = vector.broadcast %34 : vector<8x8x1xf32> to vector<8x8x8xf32>
    %36 = arith.mulf %31, %35 : vector<8x8x8xf32>
    %37 = arith.truncf %36 : vector<8x8x8xf32> to vector<8x8x8xbf16>
    "tpu.trace_start"() <{level = 10 : i32, message = "zts,zsd->ztd"}> : () -> ()
    %cst_9 = arith.constant dense<0.000000e+00> : vector<8x8x128xf32>
    %38 = tpu.matmul %37, %25, %cst_9 {dimension_numbers = #tpu.dot_dimension_numbers<[2], [1], [1], [2], [0, 0, 0, 1, 1, 2], [0], [0]>} : vector<8x8x8xbf16>, vector<8x8x128xbf16>, vector<8x8x128xf32> -> vector<8x8x128xf32>
    "tpu.trace_stop"() : () -> ()
    %39 = vector.extract_strided_slice %38 {offsets = [0, 0, 0], sizes = [4, 8, 128], strides = [1, 1, 1]} : vector<8x8x128xf32> to vector<4x8x128xf32>
    %40 = vector.shape_cast %39 : vector<4x8x128xf32> to vector<32x128xf32>
    %41 = vector.extract_strided_slice %38 {offsets = [4, 0, 0], sizes = [4, 8, 128], strides = [1, 1, 1]} : vector<8x8x128xf32> to vector<4x8x128xf32>
    %42 = vector.shape_cast %41 : vector<4x8x128xf32> to vector<32x128xf32>
    %43 = tpu.concatenate %40, %42 in 1 : vector<32x128xf32>, vector<32x128xf32> -> vector<32x256xf32>
    %44 = arith.truncf %43 : vector<32x256xf32> to vector<32x256xbf16>
    %c0_10 = arith.constant 0 : index
    %c0_11 = arith.constant 0 : index
    %45 = vector.load %arg5[%c0_10, %c0_11] : memref<4x32xf32, #tpu.memory_space<vmem>>, vector<1x32xf32>
    %46 = vector.shape_cast %45 : vector<1x32xf32> to vector<32xf32>
    %c1 = arith.constant 1 : index
    %c0_12 = arith.constant 0 : index
    %47 = vector.load %arg5[%c1, %c0_12] : memref<4x32xf32, #tpu.memory_space<vmem>>, vector<1x32xf32>
    %48 = vector.shape_cast %47 : vector<1x32xf32> to vector<32xf32>
    %c2 = arith.constant 2 : index
    %c0_13 = arith.constant 0 : index
    %49 = vector.load %arg5[%c2, %c0_13] : memref<4x32xf32, #tpu.memory_space<vmem>>, vector<1x32xf32>
    %50 = vector.shape_cast %49 : vector<1x32xf32> to vector<32xf32>
    %c3 = arith.constant 3 : index
    %c0_14 = arith.constant 0 : index
    %51 = vector.load %arg5[%c3, %c0_14] : memref<4x32xf32, #tpu.memory_space<vmem>>, vector<1x32xf32>
    %52 = vector.shape_cast %51 : vector<1x32xf32> to vector<32xf32>
    %c0_15 = arith.constant 0 : index
    %c0_16 = arith.constant 0 : index
    %53 = vector.load %arg4[%c0_15, %c0_16] : memref<256x32xbf16, #tpu.memory_space<vmem>>, vector<256x32xbf16>
    %cst_17 = arith.constant dense<0.000000e+00> : vector<32x32xf32>
    %54 = tpu.matmul %44, %53, %cst_17 {dimension_numbers = #tpu.dot_dimension_numbers<[1], [0], [0], [1], [0, 0, 1, 1], [], []>} : vector<32x256xbf16>, vector<256x32xbf16>, vector<32x32xf32> -> vector<32x32xf32>
    %55 = vector.shape_cast %46 : vector<32xf32> to vector<1x32xf32>
    %56 = vector.broadcast %55 : vector<1x32xf32> to vector<32x32xf32>
    %57 = arith.addf %54, %56 : vector<32x32xf32>
    %58 = arith.addf %57, %1 : vector<32x32xf32>
    %cst_18 = arith.constant dense<0.000000e+00> : vector<32xf32>
    %59 = vector.multi_reduction <add>, %58, %cst_18 [1] : vector<32x32xf32> to vector<32xf32>
    %60 = vector.shape_cast %59 : vector<32xf32> to vector<32x1xf32>
    %cst_19 = arith.constant 3.200000e+01 : f32
    %61 = vector.broadcast %cst_19 : f32 to vector<32x1xf32>
    %62 = arith.divf %60, %61 : vector<32x1xf32>
    %63 = vector.broadcast %62 : vector<32x1xf32> to vector<32x32xf32>
    %64 = arith.subf %58, %63 : vector<32x32xf32>
    %65 = arith.mulf %64, %64 : vector<32x32xf32>
    %cst_20 = arith.constant dense<0.000000e+00> : vector<32xf32>
    %66 = vector.multi_reduction <add>, %65, %cst_20 [1] : vector<32x32xf32> to vector<32xf32>
    %67 = vector.shape_cast %66 : vector<32xf32> to vector<32x1xf32>
    %cst_21 = arith.constant 3.200000e+01 : f32
    %68 = vector.broadcast %cst_21 : f32 to vector<32x1xf32>
    %69 = arith.divf %67, %68 : vector<32x1xf32>
    %70 = vector.broadcast %62 : vector<32x1xf32> to vector<32x32xf32>
    %71 = arith.subf %58, %70 : vector<32x32xf32>
    %cst_22 = arith.constant 9.99999974E-6 : f32
    %72 = vector.broadcast %cst_22 : f32 to vector<32x1xf32>
    %73 = arith.addf %69, %72 : vector<32x1xf32>
    %74 = math.rsqrt %73 : vector<32x1xf32>
    %75 = vector.broadcast %74 : vector<32x1xf32> to vector<32x32xf32>
    %76 = arith.mulf %71, %75 : vector<32x32xf32>
    %77 = vector.shape_cast %48 : vector<32xf32> to vector<1x32xf32>
    %78 = vector.broadcast %77 : vector<1x32xf32> to vector<32x32xf32>
    %79 = arith.mulf %76, %78 : vector<32x32xf32>
    %80 = vector.shape_cast %50 : vector<32xf32> to vector<1x32xf32>
    %81 = vector.broadcast %80 : vector<1x32xf32> to vector<32x32xf32>
    %82 = arith.addf %79, %81 : vector<32x32xf32>
    %83 = arith.truncf %82 : vector<32x32xf32> to vector<32x32xbf16>
    %c0_23 = arith.constant 0 : index
    %c0_24 = arith.constant 0 : index
    %84 = vector.load %arg6[%c0_23, %c0_24] : memref<32x64xbf16, #tpu.memory_space<vmem>>, vector<32x64xbf16>
    %cst_25 = arith.constant dense<0.000000e+00> : vector<32x64xf32>
    %85 = tpu.matmul %83, %84, %cst_25 {dimension_numbers = #tpu.dot_dimension_numbers<[1], [0], [0], [1], [0, 0, 1, 1], [], []>} : vector<32x32xbf16>, vector<32x64xbf16>, vector<32x64xf32> -> vector<32x64xf32>
    %c0_26 = arith.constant 0 : index
    %c0_27 = arith.constant 0 : index
    %86 = vector.load %arg7[%c0_26, %c0_27] : memref<1x64xf32, #tpu.memory_space<vmem>>, vector<1x64xf32>
    %87 = vector.shape_cast %86 : vector<1x64xf32> to vector<64xf32>
    %88 = vector.shape_cast %87 : vector<64xf32> to vector<1x64xf32>
    %89 = vector.broadcast %88 : vector<1x64xf32> to vector<32x64xf32>
    %90 = arith.addf %85, %89 : vector<32x64xf32>
    %cst_28 = arith.constant 0.000000e+00 : f32
    %91 = vector.broadcast %cst_28 : f32 to vector<32x64xf32>
    %92 = arith.maximumf %90, %91 : vector<32x64xf32>
    %93 = arith.truncf %92 : vector<32x64xf32> to vector<32x64xbf16>
    %c0_29 = arith.constant 0 : index
    %c0_30 = arith.constant 0 : index
    %94 = vector.load %arg8[%c0_29, %c0_30] : memref<64x32xbf16, #tpu.memory_space<vmem>>, vector<64x32xbf16>
    %cst_31 = arith.constant dense<0.000000e+00> : vector<32x32xf32>
    %95 = tpu.matmul %93, %94, %cst_31 {dimension_numbers = #tpu.dot_dimension_numbers<[1], [0], [0], [1], [0, 0, 1, 1], [], []>} : vector<32x64xbf16>, vector<64x32xbf16>, vector<32x32xf32> -> vector<32x32xf32>
    %96 = vector.shape_cast %52 : vector<32xf32> to vector<1x32xf32>
    %97 = vector.broadcast %96 : vector<1x32xf32> to vector<32x32xf32>
    %98 = arith.addf %95, %97 : vector<32x32xf32>
    %99 = arith.addf %98, %82 : vector<32x32xf32>
    %cst_32 = arith.constant dense<0.000000e+00> : vector<32xf32>
    %100 = vector.multi_reduction <add>, %99, %cst_32 [1] : vector<32x32xf32> to vector<32xf32>
    %101 = vector.shape_cast %100 : vector<32xf32> to vector<32x1xf32>
    %cst_33 = arith.constant 3.200000e+01 : f32
    %102 = vector.broadcast %cst_33 : f32 to vector<32x1xf32>
    %103 = arith.divf %101, %102 : vector<32x1xf32>
    %104 = vector.broadcast %103 : vector<32x1xf32> to vector<32x32xf32>
    %105 = arith.subf %99, %104 : vector<32x32xf32>
    %106 = arith.mulf %105, %105 : vector<32x32xf32>
    %cst_34 = arith.constant dense<0.000000e+00> : vector<32xf32>
    %107 = vector.multi_reduction <add>, %106, %cst_34 [1] : vector<32x32xf32> to vector<32xf32>
    %108 = vector.shape_cast %107 : vector<32xf32> to vector<32x1xf32>
    %cst_35 = arith.constant 3.200000e+01 : f32
    %109 = vector.broadcast %cst_35 : f32 to vector<32x1xf32>
    %110 = arith.divf %108, %109 : vector<32x1xf32>
    %111 = vector.broadcast %103 : vector<32x1xf32> to vector<32x32xf32>
    %112 = arith.subf %99, %111 : vector<32x32xf32>
    %cst_36 = arith.constant 9.99999974E-6 : f32
    %113 = vector.broadcast %cst_36 : f32 to vector<32x1xf32>
    %114 = arith.addf %110, %113 : vector<32x1xf32>
    %115 = math.rsqrt %114 : vector<32x1xf32>
    %116 = vector.broadcast %115 : vector<32x1xf32> to vector<32x32xf32>
    %117 = arith.mulf %112, %116 : vector<32x32xf32>
    %118 = vector.shape_cast %48 : vector<32xf32> to vector<1x32xf32>
    %119 = vector.broadcast %118 : vector<1x32xf32> to vector<32x32xf32>
    %120 = arith.mulf %117, %119 : vector<32x32xf32>
    %121 = vector.shape_cast %50 : vector<32xf32> to vector<1x32xf32>
    %122 = vector.broadcast %121 : vector<1x32xf32> to vector<32x32xf32>
    %123 = arith.addf %120, %122 : vector<32x32xf32>
    %124 = arith.truncf %123 : vector<32x32xf32> to vector<32x32xbf16>
    %c0_37 = arith.constant 0 : index
    %c0_38 = arith.constant 0 : index
    %125 = vector.load %arg9[%c0_37, %c0_38] : memref<32x128xbf16, #tpu.memory_space<vmem>>, vector<32x128xbf16>
    %cst_39 = arith.constant dense<0.000000e+00> : vector<32x128xf32>
    %126 = tpu.matmul %124, %125, %cst_39 {dimension_numbers = #tpu.dot_dimension_numbers<[1], [0], [0], [1], [0, 0, 1, 1], [], []>} : vector<32x32xbf16>, vector<32x128xbf16>, vector<32x128xf32> -> vector<32x128xf32>
    %c0_40 = arith.constant 0 : index
    %c0_41 = arith.constant 0 : index
    %127 = vector.load %arg10[%c0_40, %c0_41] : memref<1x128xf32, #tpu.memory_space<vmem>>, vector<1x128xf32>
    %128 = vector.shape_cast %127 : vector<1x128xf32> to vector<128xf32>
    %129 = vector.shape_cast %128 : vector<128xf32> to vector<1x128xf32>
    %130 = vector.broadcast %129 : vector<1x128xf32> to vector<32x128xf32>
    %131 = arith.addf %126, %130 : vector<32x128xf32>
    %132 = vector.shape_cast %131 : vector<32x128xf32> to vector<4x8x128xf32>
    %c0_42 = arith.constant 0 : index
    %c0_43 = arith.constant 0 : index
    %c0_44 = arith.constant 0 : index
    %133 = vector.load %arg11[%c0_42, %c0_43, %c0_44] : memref<4x8x128xf32, #tpu.memory_space<vmem>>, vector<4x8x128xf32>
    tpu.vector_store %arg11[%c0_42, %c0_43, %c0_44], %132 {strides = array<i32>} : memref<4x8x128xf32, #tpu.memory_space<vmem>>, vector<4x8x128xf32>,
    return
  }
  func.func @transform_0(%arg0: i32) -> (i32, i32, i32) {
    %c0_i32 = arith.constant 0 : i32
    %c0_i32_0 = arith.constant 0 : i32
    %c0_i32_1 = arith.constant 0 : i32
    return %arg0, %c0_i32, %c0_i32_0 : i32, i32, i32
  }
  func.func @transform_1(%arg0: i32) -> (i32, i32) {
    %c0_i32 = arith.constant 0 : i32
    %c0_i32_0 = arith.constant 0 : i32
    %c0_i32_1 = arith.constant 0 : i32
    return %c0_i32, %c0_i32_0 : i32, i32
  }
  func.func @transform_2(%arg0: i32) -> (i32, i32) {
    %c0_i32 = arith.constant 0 : i32
    %c0_i32_0 = arith.constant 0 : i32
    %c0_i32_1 = arith.constant 0 : i32
    return %c0_i32, %c0_i32_0 : i32, i32
  }
  func.func @transform_3(%arg0: i32) -> (i32, i32) {
    %c0_i32 = arith.constant 0 : i32
    %c0_i32_0 = arith.constant 0 : i32
    %c0_i32_1 = arith.constant 0 : i32
    return %c0_i32, %c0_i32_0 : i32, i32
  }
  func.func @transform_4(%arg0: i32) -> (i32, i32) {
    %c0_i32 = arith.constant 0 : i32
    %c0_i32_0 = arith.constant 0 : i32
    %c0_i32_1 = arith.constant 0 : i32
    return %c0_i32, %c0_i32_0 : i32, i32
  }
  func.func @transform_5(%arg0: i32) -> (i32, i32) {
    %c0_i32 = arith.constant 0 : i32
    %c0_i32_0 = arith.constant 0 : i32
    %c0_i32_1 = arith.constant 0 : i32
    return %c0_i32, %c0_i32_0 : i32, i32
  }
  func.func @transform_6(%arg0: i32) -> (i32, i32) {
    %c0_i32 = arith.constant 0 : i32
    %c0_i32_0 = arith.constant 0 : i32
    %c0_i32_1 = arith.constant 0 : i32
    return %c0_i32, %c0_i32_0 : i32, i32
  }
  func.func @transform_7(%arg0: i32) -> (i32, i32) {
    %c0_i32 = arith.constant 0 : i32
    %c0_i32_0 = arith.constant 0 : i32
    %c0_i32_1 = arith.constant 0 : i32
    return %c0_i32, %c0_i32_0 : i32, i32
  }
  func.func @transform_8(%arg0: i32) -> (i32, i32) {
    %c0_i32 = arith.constant 0 : i32
    %c0_i32_0 = arith.constant 0 : i32
    %c0_i32_1 = arith.constant 0 : i32
    return %c0_i32, %c0_i32_0 : i32, i32
  }
  func.func @transform_9(%arg0: i32) -> (i32, i32) {
    %c0_i32 = arith.constant 0 : i32
    %c0_i32_0 = arith.constant 0 : i32
    %c0_i32_1 = arith.constant 0 : i32
    return %c0_i32, %c0_i32_0 : i32, i32
  }
  func.func @transform_10(%arg0: i32) -> (i32, i32, i32) {
    %c0_i32 = arith.constant 0 : i32
    %c0_i32_0 = arith.constant 0 : i32
    %c0_i32_1 = arith.constant 0 : i32
    return %arg0, %c0_i32, %c0_i32_0 : i32, i32, i32
  }
}

</mosaic_0001>

<bundles_post_ra>
// kernel: tpu_custom_call.1
= control target key start
LH: loop header
LB: loop body
LE: loop exit
PB: predicated region body
PF: predicated region fallthrough
CT: control target
= control target key end

     0   :  { %v2217_v2 = vmov 0   ;;  %vm147_vm0 = vcmask 261120   ;;  %s2616_s0 = inlined_call_operand.vmem [shape: f32[4,8,32], index: 0, kind: input, shape index: {}]   ;;  %s2617_s1 = inlined_call_operand.vmem [shape: bf16[32,768], index: 1, kind: input, shape index: {}]   ;;  %s2618_s2 = inlined_call_operand.vmem [shape: f32[1,768], index: 2, kind: input, shape index: {}]   ;;  %s2619_s3 = inlined_call_operand.vmem [shape: bf16[256,32], index: 3, kind: input, shape index: {}]   ;;  %s2620_s4 = inlined_call_operand.vmem [shape: f32[4,32], index: 4, kind: input, shape index: {}]   ;;  %s2621_s5 = inlined_call_operand.vmem [shape: bf16[32,64], index: 5, kind: input, shape index: {}]   ;;  %s2622_s6 = inlined_call_operand.vmem [shape: f32[1,64], index: 6, kind: input, shape index: {}]   ;;  %s2623_s7 = inlined_call_operand.vmem [shape: bf16[64,32], index: 7, kind: input, shape index: {}]   ;;  %s2624_s8 = inlined_call_operand.vmem [shape: bf16[32,128], index: 8, kind: input, shape index: {}]   ;;  %s2625_s9 = inlined_call_operand.vmem [shape: f32[1,128], index: 9, kind: input, shape index: {}]   ;;  %s2626_s10 = inlined_call_operand.hbm [shape: f32[4,8,128], index: 10, kind: output, shape index: {}]  }
   0x1   :  { %v2105_v0 = vld [vmem:[%s2617_s1 + $0x3c] ss:$24 sps:$4 sm:$0xff]   ;;  %v2107_v1 = vld [vmem:[%s2617_s1 + $0x38] ss:$24 sps:$4 sm:$0xff]   ;;  %239 = vmatprep.mubr.bf16.mxu1 %v2217_v2  ;;  %186 = vmatprep.mubr.bf16.mxu0 %v2217_v2  ;;  %v2108_v3 = vld [vmem:[%s2617_s1 + $0xc] ss:$24 sps:$4 sm:$0xff]  }
   0x2   :  { %219 = vmatprep.subr.bf16.mxu1 %v2105_v0  ;;  %v2110_v4 = vld [vmem:[%s2617_s1 + $0x8] ss:$24 sps:$4 sm:$0xff]   ;;  %v2111_v5 = vld [vmem:[%s2617_s1 + $0x34] ss:$24 sps:$4 sm:$0xff]   ;;  %v2114_v9 = vld [vmem:[%s2617_s1 + $0x4] ss:$24 sps:$4 sm:$0xff]  }
   0x3   :  { %220 = vmatpush1.bf16.msra.mxu1 %v2107_v1  ;;  %v2113_v6 = vld [vmem:[%s2617_s1 + $0x30] ss:$24 sps:$4 sm:$0xff]   ;;  %v2299_v7 = vld [vmem:[%s2616_s0] sm:$0xff]  ;;  %166 = vmatprep.subr.bf16.mxu0 %v2111_v5  ;;  %v2328_v15 = vld [vmem:[%s2616_s0 + $0x18] sm:$0xff] }
   0x4   :  { %221 = vmatprep.subr.bf16.mxu1 %v2108_v3  ;;  %v2304_v8 = vld [vmem:[%s2616_s0 + $0x8] sm:$0xff]  ;;  %167 = vmatpush1.bf16.msra.mxu0 %v2113_v6  ;;  %v2116_v11 = vld [vmem:[%s2617_s1] ss:$24 sps:$4 sm:$0xff]   ;;  %v2119_v12 = vld [vmem:[%s2617_s1 + $0x44] ss:$24 sps:$4 sm:$0xff]  }
   0x5   :  { %v41_v10 = vpack.c.bf16 %v2304_v8, %v2299_v7  ;;  %168 = vmatprep.subr.bf16.mxu0 %v2114_v9  ;;  %v2117_v13 = vld [vmem:[%s2617_s1 + $0x40] ss:$24 sps:$4 sm:$0xff]   ;;  %v2323_v14 = vld [vmem:[%s2616_s0 + $0x10] sm:$0xff] }
   0x6   :  { %v42_v16 = vpack.c.bf16 %v2328_v15, %v2323_v14 }
   0x7   :  { %222 = vmatpush1.bf16.msra.mxu1 %v2110_v4 }
   0x8   :  { %169 = vmatpush1.bf16.msra.mxu0 %v2116_v11 }
   0x9   :  { %272 = vmatprep.subr.bf16.mxu0 %v2119_v12 }
   0xa   :  { %1805 = vmatmul.mubr.msk.bf16.vlgmr.msra.gmra.mxu1 %vm147_vm0, %v41_v10 }
   0xb   :  { %249 = vmatprep.mubr.bf16.mxu1 %v2217_v2  ;;  %1803 = vmatmul.mubr.msk.bf16.vlgmr.msra.gmra.mxu0 %vm147_vm0, %v41_v10 }
   0xc   :  { %196 = vmatprep.mubr.bf16.mxu0 %v2217_v2  ;;  %273 = vmatpush1.bf16.msra.mxu0 %v2117_v13 }
  0x12   :  { %1806 = vmatmul.mubr.msk.bf16.gmra.mxu1 %vm147_vm0, %v42_v16 }
  0x13   :  { %1804 = vmatmul.mubr.msk.bf16.gmra.mxu0 %vm147_vm0, %v42_v16 }
  0x14   :  { %292 = vmatprep.mubr.bf16.mxu0 %v2217_v2 }
  0x15   :  { %15 = vsyncpa [#allocation3], 0  ;;  %v2122_v17 = vld [vmem:[%s2617_s1 + $0x14] ss:$24 sps:$4 sm:$0xff]   ;;  %v2120_v18 = vld [vmem:[%s2617_s1 + $0x10] ss:$24 sps:$4 sm:$0xff]   ;;  %v57_v20 = vlaneseq }
  0x16   :  { %274 = vmatprep.subr.bf16.mxu0 %v2122_v17  ;;  %v2218_v19 = vmov 0.0   ;;  %vm2219_vm1 = vmmov 0   ;;  %v2356_v23 = vld [vmem:[%s2618_s2] sm:$0x3f]  ;;  %vm821_vm2 = vcmask 1043456   ;;  %vm721_vm3 = vcmask 64512  }
  0x17   :  { %275 = vmatpush1.bf16.msra.mxu0 %v2120_v18  ;;  %1975 = vmatprep.subr.bf16.mxu1 %v2218_v19  ;;  %v2350_v21 = vshrl.u32 %v57_v20, 7  ;;  %vm1571_vm4 = vcmask 523264   ;;  %s2220_s12 = smov [#allocation2]  }
  0x18   :  { %1987 = vmatprep.subr.bf16.mxu0 %v2218_v19  ;;  %1977 = vmatprep.mubr.msk.bf16.mxu1 %vm2219_vm1, %v2218_v19 }
  0x19   :  { %v67_v22 = vsub.s32 2, %v2350_v21  ;;  %v59_v24 = vsub.s32 0, %v2350_v21  ;;  %v71_v36 = vsub.s32 3, %v2350_v21  ;;  %v63_v50 = vsub.s32 1, %v2350_v21 }
  0x1a   :  { %v75_v20 = vsub.s32 4, %v2350_v21 }
  0x1b   :  { %1807 = vmatmul.mubr.msk.bf16.vlgmr.msra.gmra.mxu0 %vm147_vm0, %v41_v10  ;;  %v68_v25 = vrot.slane %v2356_v23, %v67_v22  ;;  %v60_v27 = vrot.slane %v2356_v23, %v59_v24  ;;  %v72_v44 = vrot.slane %v2356_v23, %v71_v36  ;;  %v64_v56 = vrot.slane %v2356_v23, %v63_v50 }
  0x1c   :  { %302 = vmatprep.mubr.bf16.mxu0 %v2217_v2  ;;  %v79_v22 = vsub.s32 5, %v2350_v21  ;;  %v76_v24 = vrot.slane %v2356_v23, %v75_v20 }
  0x23   :  { %1808 = vmatmul.mubr.msk.bf16.gmra.mxu0 %vm147_vm0, %v42_v16 }
  0x24   :  { %1989 = vmatprep.mubr.msk.bf16.mxu0 %vm2219_vm1, %v2218_v19 }
  0xca   :  { %v241_v26 = vpop.f32.mrf.mxu1 }
  0xcb   :  { %v242_v28 = vadd.f32 %v241_v26, %v68_v25  ;;  %v188_v31 = vpop.f32.mrf.mxu0 }
  0xcc   :  { %v243_v29 = vpop.f32.mrf.mxu1  ;;  %v189_v33 = vadd.f32 %v188_v31, %v60_v27 }
  0xcd   :  { %v1885_v30 = vpack.c.bf16 %v242_v28, %v242_v28  ;;  %v190_v34 = vpop.f32.mrf.mxu0  ;;  %v244_v52 = vadd.f32 %v243_v29, %v72_v44 }
  0xce   :  { %v245_v32 = vpop.f32.mrf.mxu1  ;;  %v1877_v39 = vpack.c.bf16 %v189_v33, %v189_v33  ;;  %v191_v61 = vadd.f32 %v190_v34, %v64_v56 }
  0xcf   :  { %1976 = vmatpush3.bf16.xpose.msra.mxu1 %v1885_v30  ;;  %v246_v37 = vadd.f32 %v245_v32, %v68_v25  ;;  %v192_v38 = vpop.f32.mrf.mxu0  ;;  %v1889_v58 = vpack.c.bf16 %v244_v52, %v244_v52 }
  0xd0   :  { %v247_v35 = vpop.f32.mrf.mxu1  ;;  %1981 = vmatprep.subr.bf16.mxu1 %v2218_v19  ;;  %v193_v51 = vadd.f32 %v192_v38, %v60_v27  ;;  %v1881_v1 = vpack.c.bf16 %v191_v61, %v191_v61 }
  0xd1   :  { %v194_v42 = vpop.f32.mrf.mxu0  ;;  %v1886_v45 = vpack.c.bf16 %v246_v37, %v246_v37  ;;  %v248_v63 = vadd.f32 %v247_v35, %v72_v44 }
  0xd2   :  { %v251_v40 = vpop.f32.mrf.mxu1  ;;  %v1878_v57 = vpack.c.bf16 %v193_v51, %v193_v51  ;;  %v195_v6 = vadd.f32 %v194_v42, %v64_v56 }
  0xd3   :  { %v252_v41 = vadd.f32 %v251_v40, %v68_v25  ;;  %v198_v47 = vpop.f32.mrf.mxu0  ;;  %v1890_v3 = vpack.c.bf16 %v248_v63, %v248_v63 }
  0xd4   :  { %v253_v43 = vpop.f32.mrf.mxu1  ;;  %v199_v49 = vadd.f32 %v198_v47, %v60_v27  ;;  %v1882_v11 = vpack.c.bf16 %v195_v6, %v195_v6 }
  0xd5   :  { %v1887_v46 = vpack.c.bf16 %v252_v41, %v252_v41  ;;  %v200_v55 = vpop.f32.mrf.mxu0  ;;  %v254_v0 = vadd.f32 %v253_v43, %v72_v44 }
  0xd6   :  { %v255_v48 = vpop.f32.mrf.mxu1  ;;  %1978 = vmatmul.mubr.bf16.vlgmr.msra.gmra.mxu1 %v1877_v39  ;;  %v1879_v54 = vpack.c.bf16 %v199_v49, %v199_v49  ;;  %v201_v9 = vadd.f32 %v200_v55, %v64_v56 }
  0xd7   :  { %1982 = vmatpush3.bf16.xpose.msra.mxu1 %v1886_v45  ;;  %1988 = vmatpush3.bf16.xpose.msra.mxu0 %v1887_v46  ;;  %v256_v53 = vadd.f32 %v255_v48, %v68_v25  ;;  %v202_v60 = vpop.f32.mrf.mxu0  ;;  %v1891_v4 = vpack.c.bf16 %v254_v0, %v254_v0  ;;  %v2393_v25 = vrot.slane %v2356_v23, %v79_v22 }
  0xd8   :  { %1983 = vmatprep.mubr.msk.bf16.mxu1 %vm2219_vm1, %v2218_v19  ;;  %1993 = vmatprep.subr.bf16.mxu1 %v2218_v19  ;;  %v203_v62 = vadd.f32 %v202_v60, %v60_v27  ;;  %v257_v5 = vpop.f32.mrf.mxu1  ;;  %v1883_v12 = vpack.c.bf16 %v201_v9, %v201_v9 }
  0xd9   :  { %1999 = vmatprep.subr.bf16.mxu0 %v2218_v19  ;;  %v1888_v59 = vpack.c.bf16 %v256_v53, %v256_v53  ;;  %v258_v10 = vadd.f32 %v257_v5, %v72_v44  ;;  %v204_v16 = vpop.f32.mrf.mxu0 }
  0xda   :  { %v1880_v2 = vpack.c.bf16 %v203_v62, %v203_v62  ;;  %v205_v17 = vadd.f32 %v204_v16, %v64_v56 }
  0xdb   :  { %v1892_v13 = vpack.c.bf16 %v258_v10, %v258_v10  ;;  %v294_v26 = vpop.f32.mrf.mxu0 }
  0xdc   :  { %v1884_v18 = vpack.c.bf16 %v205_v17, %v205_v17  ;;  %v295_v27 = vadd.f32 %v294_v26, %v76_v24 }
  0xdd   :  { %v296_v28 = vpop.f32.mrf.mxu0 }
  0xde   :  { %1984 = vmatmul.mubr.bf16.vlgmr.msra.gmra.mxu1 %v1878_v57  ;;  %1990 = vmatmul.mubr.bf16.vlgmr.msra.gmra.mxu0 %v1879_v54  ;;  %v1893_v29 = vpack.c.bf16 %v295_v27, %v295_v27  ;;  %v297_v30 = vadd.f32 %v296_v28, %v2393_v25 }
  0xdf   :  { %1994 = vmatpush3.bf16.xpose.msra.mxu1 %v1888_v59  ;;  %2000 = vmatpush3.bf16.xpose.msra.mxu0 %v1889_v58  ;;  %v298_v31 = vpop.f32.mrf.mxu0 }
  0xe0   :  { %1995 = vmatprep.mubr.msk.bf16.mxu1 %vm2219_vm1, %v2218_v19  ;;  %2001 = vmatprep.mubr.msk.bf16.mxu0 %vm2219_vm1, %v2218_v19  ;;  %v823_v32 = vsel %vm821_vm2, %v1893_v29, 0  ;;  %v1897_v33 = vpack.c.bf16 %v297_v30, %v297_v30  ;;  %v299_v34 = vadd.f32 %v298_v31, %v76_v24 }
  0xe1   :  { %2005 = vmatprep.subr.bf16.mxu1 %v2218_v19  ;;  %2011 = vmatprep.subr.bf16.mxu0 %v2218_v19  ;;  %v300_v35 = vpop.f32.mrf.mxu0 }
  0xe2   :  { %v2398_v21 = vsel %vm821_vm2, %v1897_v33, 0  ;;  %v1894_v36 = vpack.c.bf16 %v299_v34, %v299_v34  ;;  %v301_v23 = vadd.f32 %v300_v35, %v2393_v25 }
  0xe3   :  { %v304_v37 = vpop.f32.mrf.mxu0 }
  0xe4   :  { %v869_v38 = vsel %vm821_vm2, %v1894_v36, 0  ;;  %v1898_v39 = vpack.c.bf16 %v301_v23, %v301_v23  ;;  %v305_v40 = vadd.f32 %v304_v37, %v76_v24 }
  0xe5   :  { %v306_v41 = vpop.f32.mrf.mxu0 }
  0xe6   :  { %1996 = vmatmul.mubr.bf16.vlgmr.msra.gmra.mxu1 %v1880_v2  ;;  %2002 = vmatmul.mubr.bf16.vlgmr.msra.gmra.mxu0 %v1881_v1  ;;  %v2404_v42 = vsel %vm821_vm2, %v1898_v39, 0  ;;  %v1895_v43 = vpack.c.bf16 %v305_v40, %v305_v40  ;;  %v307_v44 = vadd.f32 %v306_v41, %v2393_v25 }
  0xe7   :  { %2006 = vmatpush3.bf16.xpose.msra.mxu1 %v1890_v3  ;;  %2012 = vmatpush3.bf16.xpose.msra.mxu0 %v1891_v4  ;;  %v308_v45 = vpop.f32.mrf.mxu0 }
  0xe8   :  { %2007 = vmatprep.mubr.msk.bf16.mxu1 %vm2219_vm1, %v2218_v19  ;;  %2013 = vmatprep.mubr.msk.bf16.mxu0 %vm2219_vm1, %v2218_v19  ;;  %v2409_v46 = vsel %vm821_vm2, %v1895_v43, 0  ;;  %v1899_v47 = vpack.c.bf16 %v307_v44, %v307_v44  ;;  %v309_v48 = vadd.f32 %v308_v45, %v76_v24 }
  0xe9   :  { %2017 = vmatprep.subr.bf16.mxu1 %v2218_v19  ;;  %2023 = vmatprep.subr.bf16.mxu0 %v2218_v19  ;;  %v2418_v56 = vpop.f32.mrf.mxu0 }
  0xea   :  { %v2412_v49 = vsel %vm821_vm2, %v1899_v47, 0  ;;  %v1896_v50 = vpack.c.bf16 %v309_v48, %v309_v48 }
  0xec   :  { %v2415_v51 = vsel %vm821_vm2, %v1896_v50, 0 }
  0xee   :  { %2008 = vmatmul.mubr.bf16.vlgmr.msra.gmra.mxu1 %v1882_v11  ;;  %2014 = vmatmul.mubr.bf16.vlgmr.msra.gmra.mxu0 %v1883_v12 }
  0xef   :  { %2018 = vmatpush3.bf16.xpose.msra.mxu1 %v1892_v13  ;;  %2019 = vmatprep.mubr.msk.bf16.mxu1 %vm2219_vm1, %v2218_v19 }
  0xf0   :  { %2029 = vmatprep.subr.bf16.mxu1 %v2218_v19  ;;  %2025 = vmatprep.mubr.msk.bf16.mxu0 %vm2219_vm1, %v2218_v19 }
  0xf1   :  { %2024 = vmatpush3.bf16.msra.mxu0 %v823_v32 }
  0xf2   :  { %2035 = vmatprep.subr.bf16.mxu0 %v2218_v19 }
  0xf6   :  { %2020 = vmatmul.mubr.bf16.vlgmr.msra.gmra.mxu1 %v1884_v18 }
  0xf7   :  { %2031 = vmatprep.mubr.msk.bf16.mxu1 %vm2219_vm1, %v2218_v19  ;;  %2030 = vmatpush3.bf16.msra.mxu1 %v869_v38 }
  0xf8   :  { %2041 = vmatprep.subr.bf16.mxu1 %v2218_v19 }
 0x196   :  { %v435_v52 = vpop.f32.mrf.mxu1 }
 0x197   :  { %v722_v53 = vsel %vm721_vm3, %v435_v52, -inf }
 0x198   :  { %723 = vmax.xlane.f32.xlu0 %v722_v53  ;;  %v1979_v54 = vpop.f32.mrf.mxu1 }
 0x19a   :  { %v438_v55 = vpop.f32.mrf.mxu1 }
 0x19c   :  { %v1980_v57 = vpop.f32.mrf.mxu1 }
 0x19e   :  { %v475_v58 = vpop.f32.mrf.mxu1  ;;  %v515_v59 = vpop.f32.mrf.mxu0 }
 0x19f   :  { %v728_v60 = vsel %vm721_vm3, %v515_v59, -inf  ;;  %v725_v61 = vsel %vm721_vm3, %v475_v58, -inf }
 0x1a0   :  { %729 = vmax.xlane.f32.xlu1 %v728_v60  ;;  %v1991_v62 = vpop.f32.mrf.mxu0  ;;  %726 = vmax.xlane.f32.xlu0 %v725_v61  ;;  %v1985_v63 = vpop.f32.mrf.mxu1 }
 0x1a2   :  { %v478_v0 = vpop.f32.mrf.mxu1  ;;  %v518_v1 = vpop.f32.mrf.mxu0 }
 0x1a4   :  { %v1986_v2 = vpop.f32.mrf.mxu1  ;;  %v1992_v3 = vpop.f32.mrf.mxu0 }
 0x1a6   :  { %v555_v4 = vpop.f32.mrf.mxu1  ;;  %v595_v5 = vpop.f32.mrf.mxu0 }
 0x1a7   :  { %v734_v6 = vsel %vm721_vm3, %v595_v5, -inf  ;;  %v731_v9 = vsel %vm721_vm3, %v555_v4, -inf }
 0x1a8   :  { %v2003_v10 = vpop.f32.mrf.mxu0  ;;  %735 = vmax.xlane.f32.xlu0 %v734_v6  ;;  %732 = vmax.xlane.f32.xlu1 %v731_v9  ;;  %v1997_v11 = vpop.f32.mrf.mxu1 }
 0x1aa   :  { %v558_v12 = vpop.f32.mrf.mxu1  ;;  %v598_v13 = vpop.f32.mrf.mxu0 }
 0x1ac   :  { %v1998_v16 = vpop.f32.mrf.mxu1  ;;  %v2004_v17 = vpop.f32.mrf.mxu0 }
 0x1ae   :  { %v635_v18 = vpop.f32.mrf.mxu1  ;;  %v675_v20 = vpop.f32.mrf.mxu0 }
 0x1af   :  { %v740_v22 = vsel %vm721_vm3, %v675_v20, -inf  ;;  %v737_v24 = vsel %vm721_vm3, %v635_v18, -inf }
 0x1b0   :  { %v2015_v26 = vpop.f32.mrf.mxu0  ;;  %741 = vmax.xlane.f32.xlu0 %v740_v22  ;;  %738 = vmax.xlane.f32.xlu1 %v737_v24  ;;  %v2009_v27 = vpop.f32.mrf.mxu1 }
 0x1b2   :  { %v638_v28 = vpop.f32.mrf.mxu1  ;;  %v678_v29 = vpop.f32.mrf.mxu0 }
 0x1b4   :  { %v2010_v30 = vpop.f32.mrf.mxu1  ;;  %v2016_v31 = vpop.f32.mrf.mxu0 }
 0x1b6   :  { %v715_v32 = vpop.f32.mrf.mxu1 }
 0x1b7   :  { %v743_v33 = vsel %vm721_vm3, %v715_v32, -inf }
 0x1b8   :  { %744 = vmax.xlane.f32.xlu1 %v743_v33  ;;  %v2021_v34 = vpop.f32.mrf.mxu1 }
 0x1ba   :  { %v718_v35 = vpop.f32.mrf.mxu1 }
 0x1bc   :  { %v2022_v36 = vpop.f32.mrf.mxu1 }
 0x221   :  { %v724_v23 = vpop.xlane.xlu0 %723 }
 0x222   :  { %v746_v37 = vsub.f32 %v435_v52, %v724_v23 }
 0x224   :  { %v754_v38 = vmul.f32 1.442695, %v746_v37 }
 0x226   :  { %2147 = vpow2.f32 %v754_v38 }
 0x229   :  { %v730_v39 = vpop.xlane.xlu1 %729  ;;  %v727_v40 = vpop.xlane.xlu0 %726 }
 0x22a   :  { %v748_v41 = vsub.f32 %v515_v59, %v730_v39  ;;  %v747_v43 = vsub.f32 %v475_v58, %v727_v40 }
 0x22c   :  { %v758_v44 = vmul.f32 1.442695, %v748_v41  ;;  %v756_v45 = vmul.f32 1.442695, %v747_v43 }
 0x22e   :  { %2149 = vpow2.f32 %v758_v44 }
 0x22f   :  { %2151 = vpow2.f32 %v756_v45 }
 0x231   :  { %v736_v47 = vpop.xlane.xlu0 %735  ;;  %v733_v48 = vpop.xlane.xlu1 %732 }
 0x232   :  { %v750_v50 = vsub.f32 %v595_v5, %v736_v47  ;;  %v749_v53 = vsub.f32 %v555_v4, %v733_v48  ;;  %v311_v47 = vadd.f32 %v2418_v56, %v2393_v25 }
 0x233   :  { %v2148_v54 = vpop.eup %2147 }
 0x234   :  { %v762_v55 = vmul.f32 1.442695, %v750_v50  ;;  %v760_v57 = vmul.f32 1.442695, %v749_v53  ;;  %v770_v60 = vsel %vm721_vm3, %v2148_v54, 0.0  ;;  %v1900_v25 = vpack.c.bf16 %v311_v47, %v311_v47 }
 0x235   :  { %771 = vadd.xlane.f32.xlu0 %v770_v60 }
 0x236   :  { %2153 = vpow2.f32 %v762_v55  ;;  %v1145_v55 = vsel %vm821_vm2, %v1900_v25, 0  ;;  %v1841_v25 = vld [vmem:[%s2620_s4] ss:$0 sm:$0xff] }
 0x237   :  { %2155 = vpow2.f32 %v760_v57 }
 0x239   :  { %v742_v52 = vpop.xlane.xlu0 %741  ;;  %v739_v61 = vpop.xlane.xlu1 %738 }
 0x23a   :  { %v752_v59 = vsub.f32 %v675_v20, %v742_v52  ;;  %v751_v58 = vsub.f32 %v635_v18, %v739_v61  ;;  %v2125_v61 = vld [vmem:[%s2619_s3 + $0x70] sm:$0xff]  }
 0x23b   :  { %v2150_v62 = vpop.eup %2149 }
 0x23c   :  { %v2152_v63 = vpop.eup %2151  ;;  %v766_v0 = vmul.f32 1.442695, %v752_v59  ;;  %v764_v1 = vmul.f32 1.442695, %v751_v58  ;;  %v776_v2 = vsel %vm721_vm3, %v2150_v62, 0.0  ;;  %v2126_v59 = vld [vmem:[%s2619_s3 + $0x30] sm:$0xff]  }
 0x23d   :  { %777 = vadd.xlane.f32.xlu0 %v776_v2  ;;  %v773_v3 = vsel %vm721_vm3, %v2152_v63, 0.0  ;;  %v2128_v58 = vld [vmem:[%s2619_s3 + $0x28] sm:$0xff]   ;;  %v2133_v2 = vld [vmem:[%s2619_s3 + $0x50] sm:$0xff]  }
 0x23e   :  { %2157 = vpow2.f32 %v766_v0  ;;  %774 = vadd.xlane.f32.xlu1 %v773_v3  ;;  %v2131_v0 = vld [vmem:[%s2619_s3 + $0x58] sm:$0xff]   ;;  %v2134_v3 = vld [vmem:[%s2619_s3 + $0x10] sm:$0xff]  }
 0x23f   :  { %2159 = vpow2.f32 %v764_v1  ;;  %v2132_v1 = vld [vmem:[%s2619_s3 + $0x18] sm:$0xff]  }
 0x241   :  { %v745_v4 = vpop.xlane.xlu1 %744 }
 0x242   :  { %v753_v5 = vsub.f32 %v715_v32, %v745_v4  ;;  %v2135_v4 = vld [vmem:[%s2619_s3 + $0x48] sm:$0xff]  }
 0x243   :  { %v2154_v6 = vpop.eup %2153 }
 0x244   :  { %v2156_v9 = vpop.eup %2155  ;;  %v768_v10 = vmul.f32 1.442695, %v753_v5  ;;  %v782_v11 = vsel %vm721_vm3, %v2154_v6, 0.0  ;;  %v2136_v5 = vld [vmem:[%s2619_s3 + $0x8] sm:$0xff]  }
 0x245   :  { %783 = vadd.xlane.f32.xlu0 %v782_v11  ;;  %v779_v12 = vsel %vm721_vm3, %v2156_v9, 0.0 }
 0x246   :  { %2161 = vpow2.f32 %v768_v10  ;;  %780 = vadd.xlane.f32.xlu1 %v779_v12 }
 0x24b   :  { %v2432_v13 = vpop.eup %2157 }
 0x24c   :  { %v2434_v16 = vpop.eup %2159  ;;  %v788_v17 = vsel %vm721_vm3, %v2432_v13, 0.0 }
 0x24d   :  { %789 = vadd.xlane.f32.xlu0 %v788_v17  ;;  %v785_v18 = vsel %vm721_vm3, %v2434_v16, 0.0 }
 0x24e   :  { %786 = vadd.xlane.f32.xlu1 %v785_v18 }
 0x253   :  { %v2440_v20 = vpop.eup %2161 }
 0x254   :  { %v791_v22 = vsel %vm721_vm3, %v2440_v20, 0.0 }
 0x255   :  { %792 = vadd.xlane.f32.xlu1 %v791_v22 }
 0x2be   :  { %v772_v24 = vpop.xlane.xlu0 %771 }
 0x2bf   :  { %2163 = vrcp.f32 %v772_v24 }
 0x2c6   :  { %v778_v26 = vpop.xlane.xlu0 %777 }
 0x2c7   :  { %2165 = vrcp.f32 %v778_v26  ;;  %v775_v27 = vpop.xlane.xlu1 %774 }
 0x2c8   :  { %2167 = vrcp.f32 %v775_v27 }
 0x2cc   :  { %v2164_v28 = vpop.eup %2163 }
 0x2cd   :  { %v802_v29 = vmul.f32 %v2164_v28, %v2148_v54 }
 0x2ce   :  { %v784_v30 = vpop.xlane.xlu0 %783 }
 0x2cf   :  { %2169 = vrcp.f32 %v784_v30  ;;  %v781_v31 = vpop.xlane.xlu1 %780  ;;  %v810_v32 = vpack.c.bf16 %v802_v29, %v802_v29 }
 0x2d0   :  { %2171 = vrcp.f32 %v781_v31 }
 0x2d1   :  { %2026 = vmatmul.mubr.msk.bf16.vlgmr.msra.gmra.mxu0 %vm721_vm3, %v810_v32 }
 0x2d2   :  { %2036 = vmatpush3.bf16.msra.mxu0 %v2409_v46  ;;  %2037 = vmatprep.mubr.msk.bf16.mxu0 %vm2219_vm1, %v2218_v19 }
 0x2d3   :  { %2047 = vmatprep.subr.bf16.mxu0 %v2218_v19 }
 0x2d4   :  { %v2166_v33 = vpop.eup %2165 }
 0x2d5   :  { %v2168_v34 = vpop.eup %2167  ;;  %v804_v35 = vmul.f32 %v2166_v33, %v2150_v62  ;;  %v2129_v62 = vld [vmem:[%s2619_s3 + $0x60] sm:$0xff]  }
 0x2d6   :  { %v790_v36 = vpop.xlane.xlu0 %789  ;;  %v803_v23 = vmul.f32 %v2168_v34, %v2152_v63  ;;  %v2130_v63 = vld [vmem:[%s2619_s3 + $0x20] sm:$0xff]  }
 0x2d7   :  { %2173 = vrcp.f32 %v790_v36  ;;  %v787_v37 = vpop.xlane.xlu1 %786  ;;  %v812_v38 = vpack.c.bf16 %v804_v35, %v804_v35 }
 0x2d8   :  { %2175 = vrcp.f32 %v787_v37  ;;  %v811_v39 = vpack.c.bf16 %v803_v23, %v803_v23 }
 0x2d9   :  { %2038 = vmatmul.mubr.msk.bf16.vlgmr.msra.gmra.mxu0 %vm721_vm3, %v812_v38 }
 0x2da   :  { %2032 = vmatmul.mubr.msk.bf16.vlgmr.msra.gmra.mxu1 %vm721_vm3, %v811_v39  ;;  %2048 = vmatpush3.bf16.msra.mxu0 %v2398_v21 }
 0x2db   :  { %2042 = vmatpush3.bf16.msra.mxu1 %v2415_v51  ;;  %2043 = vmatprep.mubr.msk.bf16.mxu1 %vm2219_vm1, %v2218_v19  ;;  %v2123_v51 = vld [vmem:[%s2619_s3 + $0x78] sm:$0xff]  }
 0x2dc   :  { %v2170_v46 = vpop.eup %2169  ;;  %2049 = vmatprep.mubr.msk.bf16.mxu0 %vm2219_vm1, %v2218_v19  ;;  %2053 = vmatprep.subr.bf16.mxu1 %v2218_v19 }
 0x2dd   :  { %v2172_v40 = vpop.eup %2171  ;;  %2059 = vmatprep.subr.bf16.mxu0 %v2218_v19  ;;  %v806_v41 = vmul.f32 %v2170_v46, %v2154_v6  ;;  %v2137_v6 = vld [vmem:[%s2619_s3 + $0x40] sm:$0xff]  }
 0x2de   :  { %v793_v43 = vpop.xlane.xlu1 %792  ;;  %v805_v44 = vmul.f32 %v2172_v40, %v2156_v9  ;;  %v2138_v9 = vld [vmem:[%s2619_s3] sm:$0xff]  }
 0x2df   :  { %2177 = vrcp.f32 %v793_v43  ;;  %v814_v45 = vpack.c.bf16 %v806_v41, %v806_v41 }
 0x2e0   :  { %v813_v21 = vpack.c.bf16 %v805_v44, %v805_v44 }
 0x2e1   :  { %2050 = vmatmul.mubr.msk.bf16.vlgmr.msra.gmra.mxu0 %vm721_vm3, %v814_v45 }
 0x2e2   :  { %2044 = vmatmul.mubr.msk.bf16.vlgmr.msra.gmra.mxu1 %vm721_vm3, %v813_v21  ;;  %2060 = vmatpush3.bf16.msra.mxu0 %v2412_v49 }
 0x2e3   :  { %2054 = vmatpush3.bf16.msra.mxu1 %v2404_v42  ;;  %2055 = vmatprep.mubr.msk.bf16.mxu1 %vm2219_vm1, %v2218_v19  ;;  %v2124_v42 = vld [vmem:[%s2619_s3 + $0x38] sm:$0xff]  }
 0x2e4   :  { %v2174_v48 = vpop.eup %2173  ;;  %2061 = vmatprep.mubr.msk.bf16.mxu0 %vm2219_vm1, %v2218_v19  ;;  %2065 = vmatprep.subr.bf16.mxu1 %v2218_v19 }
 0x2e5   :  { %v2176_v50 = vpop.eup %2175  ;;  %v808_v53 = vmul.f32 %v2174_v48, %v2432_v13  ;;  %1933 = vmatprep.subr.bf16.mxu0 %v2123_v51 }
 0x2e6   :  { %v807_v56 = vmul.f32 %v2176_v50, %v2434_v16 }
 0x2e7   :  { %v816_v49 = vpack.c.bf16 %v808_v53, %v808_v53 }
 0x2e8   :  { %v815_v54 = vpack.c.bf16 %v807_v56, %v807_v56 }
 0x2e9   :  { %2062 = vmatmul.mubr.msk.bf16.vlgmr.msra.gmra.mxu0 %vm721_vm3, %v816_v49 }
 0x2ea   :  { %2056 = vmatmul.mubr.msk.bf16.vlgmr.msra.gmra.mxu1 %vm721_vm3, %v815_v54  ;;  %1934 = vmatpush3.bf16.msra.mxu0 %v2124_v42 }
 0x2eb   :  { %2066 = vmatpush3.bf16.msra.mxu1 %v1145_v55  ;;  %2067 = vmatprep.mubr.msk.bf16.mxu1 %vm2219_vm1, %v2218_v19  ;;  %v2127_v19 = vld [vmem:[%s2619_s3 + $0x68] sm:$0xff]   ;;  %s1780_s3 = sshll.u32 %s2220_s12, 4  ;;  %s1781_s3 = int_to_ptr.vmem [resolvable:$true] %s1780_s3 }
 0x2ec   :  { %v2178_v57 = vpop.eup %2177  ;;  %1935 = vmatprep.subr.bf16.mxu0 %v2125_v61  ;;  %s2195_s13 = scalar_lea.vmem %s1781_s3, 512  ;;  %p2200_p1 = scmp.lt.s32.totalorder %s1781_s3, %s1781_s3 }
 0x2ed   :  { %v809_v60 = vmul.f32 %v2178_v57, %v2440_v20  ;;  %p2196_p0 = scmp.ne.s32.totalorder %s1781_s3, %s2195_s13  ;;  %p2201_p2 = scmp.lt.s32.totalorder %s2195_s13, %s2195_s13 }
 0x2ee   :  { %1936 = vmatpush3.bf16.msra.mxu0 %v2126_v59 }
 0x2ef   :  { %v817_v52 = vpack.c.bf16 %v809_v60, %v809_v60  ;;  %1937 = vmatprep.subr.bf16.mxu0 %v2127_v19  ;;  %p2202_p3 = por %p2201_p2, %p2200_p1 }
 0x2f1   :  { %p2203_p4 = pnand %p2202_p3, %p2196_p0 }
 0x2f2   :  { %2068 = vmatmul.mubr.msk.bf16.vlgmr.msra.gmra.mxu1 %vm721_vm3, %v817_v52  ;;  %1938 = vmatpush3.bf16.msra.mxu0 %v2128_v58 }
 0x2f3   :  { %1939 = vmatprep.subr.bf16.mxu0 %v2129_v62 }
 0x2f6   :  { %1940 = vmatpush3.bf16.msra.mxu0 %v2130_v63 }
 0x2f7   :  { %1941 = vmatprep.subr.bf16.mxu0 %v2131_v0 }
 0x2fa   :  { %1942 = vmatpush3.bf16.msra.mxu0 %v2132_v1 }
 0x2fb   :  { %1943 = vmatprep.subr.bf16.mxu0 %v2133_v2 }
 0x2fe   :  { %1944 = vmatpush3.bf16.msra.mxu0 %v2134_v3 }
 0x2ff   :  { %1945 = vmatprep.subr.bf16.mxu0 %v2135_v4 }
 0x302   :  { %1946 = vmatpush3.bf16.msra.mxu0 %v2136_v5 }
 0x303   :  { %1947 = vmatprep.subr.bf16.mxu0 %v2137_v6 }
 0x306   :  { %1948 = vmatpush3.bf16.msra.mxu0 %v2138_v9 }
 0x391   :  { %v859_v10 = vpop.f32.mrf.mxu0 }
 0x393   :  { %v2027_v11 = vpop.f32.mrf.mxu0 }
 0x395   :  { %v862_v12 = vpop.f32.mrf.mxu0 }
 0x397   :  { %v2028_v13 = vpop.f32.mrf.mxu0 }
 0x399   :  { %v951_v16 = vpop.f32.mrf.mxu0 }
 0x39a   :  { %v905_v17 = vpop.f32.mrf.mxu1 }
 0x39b   :  { %v2039_v18 = vpop.f32.mrf.mxu0  ;;  %v1187_v39 = vpack.c.bf16 %v905_v17, %v859_v10 }
 0x39c   :  { %v2033_v20 = vpop.f32.mrf.mxu1 }
 0x39d   :  { %v954_v22 = vpop.f32.mrf.mxu0 }
 0x39e   :  { %v908_v24 = vpop.f32.mrf.mxu1 }
 0x39f   :  { %v2040_v26 = vpop.f32.mrf.mxu0 }
 0x3a0   :  { %v2034_v27 = vpop.f32.mrf.mxu1 }
 0x3a1   :  { %v1043_v28 = vpop.f32.mrf.mxu0 }
 0x3a2   :  { %v997_v29 = vpop.f32.mrf.mxu1 }
 0x3a3   :  { %v2051_v30 = vpop.f32.mrf.mxu0  ;;  %v1189_v51 = vpack.c.bf16 %v997_v29, %v951_v16 }
 0x3a4   :  { %v2045_v31 = vpop.f32.mrf.mxu1 }
 0x3a5   :  { %v1046_v32 = vpop.f32.mrf.mxu0 }
 0x3a6   :  { %v1000_v33 = vpop.f32.mrf.mxu1 }
 0x3a7   :  { %v2052_v34 = vpop.f32.mrf.mxu0  ;;  %v2139_v33 = vld [vmem:[%s2621_s5 + $0x8] sm:$0xff]  }
 0x3a8   :  { %v2046_v35 = vpop.f32.mrf.mxu1  ;;  %v2140_v34 = vld [vmem:[%s2621_s5] sm:$0xff]   ;;  %2071 = vmatprep.subr.bf16.mxu1 %v2139_v33 }
 0x3a9   :  { %v1135_v36 = vpop.f32.mrf.mxu0  ;;  %2072 = vmatpush3.bf16.msra.mxu1 %v2139_v33  ;;  %v2141_v35 = vld [vmem:[%s2623_s7 + $0x18] sm:$0xff]  }
 0x3aa   :  { %v1089_v23 = vpop.f32.mrf.mxu1  ;;  %2073 = vmatprep.subr.bf16.mxu1 %v2140_v34 }
 0x3ab   :  { %v1188_v37 = vpack.c.bf16 %v1089_v23, %v1043_v28  ;;  %v2063_v38 = vpop.f32.mrf.mxu0 }
 0x3ac   :  { %v2057_v46 = vpop.f32.mrf.mxu1 }
 0x3ad   :  { %1359 = vmatprep.mubr.bf16.mxu0 %v1188_v37  ;;  %v1138_v40 = vpop.f32.mrf.mxu0  ;;  %2074 = vmatpush3.bf16.msra.mxu1 %v2140_v34 }
 0x3ae   :  { %v1092_v41 = vpop.f32.mrf.mxu1  ;;  %1360 = vmatmul.mubr.bf16.vlgmr.msra.gmra.mxu0 %v1187_v39  ;;  %2079 = vmatprep.subr.bf16.mxu1 %v2141_v35 }
 0x3af   :  { %v2064_v43 = vpop.f32.mrf.mxu0 }
 0x3b0   :  { %v2058_v44 = vpop.f32.mrf.mxu1 }
 0x3b2   :  { %v1181_v45 = vpop.f32.mrf.mxu1 }
 0x3b3   :  { %v1190_v21 = vpack.c.bf16 %v1181_v45, %v1135_v36 }
 0x3b4   :  { %v2069_v47 = vpop.f32.mrf.mxu1 }
 0x3b5   :  { %1367 = vmatprep.mubr.bf16.mxu0 %v1190_v21 }
 0x3b6   :  { %v1184_v48 = vpop.f32.mrf.mxu1  ;;  %1368 = vmatmul.mubr.bf16.gmra.mxu0 %v1189_v51 }
 0x3b7   :  { %v2554_v48 = vld [vmem:[%s2620_s4 + $0x1] ss:$0 sm:$0xff] }
 0x3b8   :  { %v2070_v50 = vpop.f32.mrf.mxu1 }
 0x46e   :  { %v1949_v53 = vpop.f32.mrf.mxu0 }
 0x470   :  { %v1950_v56 = vpop.f32.mrf.mxu0 }
 0x471   :  { %v1951_v42 = vadd.f32 %v1950_v56, %v1949_v53  ;;  %v2560_v56 = vld [vmem:[%s2620_s4 + $0x2] ss:$0 sm:$0xff] }
 0x472   :  { %v1952_v49 = vpop.f32.mrf.mxu0 }
 0x473   :  { %v1362_v54 = vadd.f32 %v1951_v42, %v1841_v25 }
 0x474   :  { %v1953_v55 = vpop.f32.mrf.mxu0 }
 0x475   :  { %v1954_v57 = vadd.f32 %v1953_v55, %v1952_v49  ;;  %v1376_v60 = vadd.f32 %v1362_v54, %v2299_v7 }
 0x476   :  { %v1955_v52 = vpop.f32.mrf.mxu0 }
 0x477   :  { %v1365_v61 = vadd.f32 %v1954_v57, %v1841_v25  ;;  %v1380_v59 = vsel %vm147_vm0, %v1376_v60, 0.0 }
 0x478   :  { %1381 = vadd.xlane.f32.xlu0 %v1380_v59  ;;  %v1956_v19 = vpop.f32.mrf.mxu0 }
 0x479   :  { %v1957_v58 = vadd.f32 %v1956_v19, %v1955_v52  ;;  %v1377_v62 = vadd.f32 %v1365_v61, %v2304_v8 }
 0x47a   :  { %v1958_v63 = vpop.f32.mrf.mxu0 }
 0x47b   :  { %v1370_v0 = vadd.f32 %v1957_v58, %v1841_v25  ;;  %v1383_v1 = vsel %vm147_vm0, %v1377_v62, 0.0 }
 0x47c   :  { %1384 = vadd.xlane.f32.xlu1 %v1383_v1  ;;  %v1959_v2 = vpop.f32.mrf.mxu0  ;;  %v2143_v1 = vld [vmem:[%s2623_s7 + $0x8] sm:$0xff]  }
 0x47d   :  { %v1960_v3 = vadd.f32 %v1959_v2, %v1958_v63  ;;  %v1378_v4 = vadd.f32 %v1370_v0, %v2323_v14  ;;  %v2142_v0 = vld [vmem:[%s2623_s7 + $0x10] sm:$0xff]   ;;  %v2144_v2 = vld [vmem:[%s2623_s7] sm:$0xff]  }
 0x47f   :  { %v1373_v5 = vadd.f32 %v1960_v3, %v1841_v25  ;;  %v1386_v7 = vsel %vm147_vm0, %v1378_v4, 0.0 }
 0x480   :  { %1387 = vadd.xlane.f32.xlu0 %v1386_v7 }
 0x481   :  { %v1379_v6 = vadd.f32 %v1373_v5, %v2328_v15  ;;  %v1860_v5 = vld [vmem:[%s2622_s6] ss:$0 sm:$0xff] }
 0x483   :  { %v1389_v9 = vsel %vm147_vm0, %v1379_v6, 0.0 }
 0x484   :  { %1390 = vadd.xlane.f32.xlu1 %v1389_v9 }
 0x501   :  { %v1382_v10 = vpop.xlane.xlu0 %1381 }
 0x502   :  { %v1393_v8 = vmul.f32 0.03125, %v1382_v10 }
 0x504   :  { %v1397_v11 = vsub.f32 %v1376_v60, %v1393_v8 }
 0x505   :  { %v1385_v12 = vpop.xlane.xlu1 %1384 }
 0x506   :  { %v1394_v13 = vmul.f32 0.03125, %v1385_v12  ;;  %v1401_v16 = vmul.f32 %v1397_v11, %v1397_v11 }
 0x508   :  { %v1398_v17 = vsub.f32 %v1377_v62, %v1394_v13  ;;  %v1405_v18 = vsel %vm147_vm0, %v1401_v16, 0.0 }
 0x509   :  { %1406 = vadd.xlane.f32.xlu0 %v1405_v18  ;;  %v1388_v14 = vpop.xlane.xlu0 %1387 }
 0x50a   :  { %v1395_v20 = vmul.f32 0.03125, %v1388_v14  ;;  %v1402_v22 = vmul.f32 %v1398_v17, %v1398_v17 }
 0x50c   :  { %v1399_v24 = vsub.f32 %v1378_v4, %v1395_v20  ;;  %v1408_v26 = vsel %vm147_vm0, %v1402_v22, 0.0  ;;  %v1865_v22 = vld [vmem:[%s2620_s4 + $0x3] ss:$0 sm:$0xff] }
 0x50d   :  { %1409 = vadd.xlane.f32.xlu1 %v1408_v26  ;;  %v1391_v15 = vpop.xlane.xlu1 %1390 }
 0x50e   :  { %v1396_v27 = vmul.f32 0.03125, %v1391_v15  ;;  %v1403_v28 = vmul.f32 %v1399_v24, %v1399_v24 }
 0x510   :  { %v1400_v29 = vsub.f32 %v1379_v6, %v1396_v27  ;;  %v1411_v30 = vsel %vm147_vm0, %v1403_v28, 0.0 }
 0x511   :  { %1412 = vadd.xlane.f32.xlu0 %v1411_v30 }
 0x512   :  { %v1404_v31 = vmul.f32 %v1400_v29, %v1400_v29 }
 0x514   :  { %v1414_v32 = vsel %vm147_vm0, %v1404_v31, 0.0 }
 0x515   :  { %1415 = vadd.xlane.f32.xlu1 %v1414_v32 }
 0x592   :  { %v1407_v36 = vpop.xlane.xlu0 %1406 }
 0x593   :  { %v1417_v23 = vmul.f32 0.03125, %v1407_v36 }
 0x595   :  { %v1421_v37 = vadd.f32 1e-05, %v1417_v23 }
 0x596   :  { %v1410_v38 = vpop.xlane.xlu1 %1409 }
 0x597   :  { %2179 = vrsqrt.f32 %v1421_v37  ;;  %v1418_v39 = vmul.f32 0.03125, %v1410_v38 }
 0x599   :  { %v1422_v46 = vadd.f32 1e-05, %v1418_v39 }
 0x59a   :  { %v1413_v40 = vpop.xlane.xlu0 %1412 }
 0x59b   :  { %2181 = vrsqrt.f32 %v1422_v46  ;;  %v1419_v41 = vmul.f32 0.03125, %v1413_v40 }
 0x59d   :  { %v1423_v43 = vadd.f32 1e-05, %v1419_v41 }
 0x59e   :  { %v1416_v44 = vpop.xlane.xlu1 %1415 }
 0x59f   :  { %2183 = vrsqrt.f32 %v1423_v43  ;;  %v1420_v45 = vmul.f32 0.03125, %v1416_v44 }
 0x5a1   :  { %v1424_v21 = vadd.f32 1e-05, %v1420_v45 }
 0x5a3   :  { %2185 = vrsqrt.f32 %v1424_v21 }
 0x5a4   :  { %v2180_v51 = vpop.eup %2179 }
 0x5a5   :  { %v1429_v47 = vmul.f32 %v2180_v51, %v1397_v11 }
 0x5a7   :  { %v1437_v25 = vmul.f32 %v2554_v48, %v1429_v47 }
 0x5a8   :  { %v2182_v50 = vpop.eup %2181 }
 0x5a9   :  { %v1430_v53 = vmul.f32 %v2182_v50, %v1398_v17  ;;  %v1445_v55 = vadd.f32 %v2560_v56, %v1437_v25 }
 0x5ab   :  { %v1438_v42 = vmul.f32 %v2554_v48, %v1430_v53 }
 0x5ac   :  { %v2184_v49 = vpop.eup %2183 }
 0x5ad   :  { %v1431_v54 = vmul.f32 %v2184_v49, %v1399_v24  ;;  %v1446_v57 = vadd.f32 %v2560_v56, %v1438_v42 }
 0x5af   :  { %v1449_v60 = vpack.c.bf16 %v1446_v57, %v1445_v55  ;;  %v1439_v59 = vmul.f32 %v2554_v48, %v1431_v54 }
 0x5b0   :  { %v2186_v52 = vpop.eup %2185 }
 0x5b1   :  { %v1432_v61 = vmul.f32 %v2186_v52, %v1400_v29  ;;  %2075 = vmatprep.mubr.msk.bf16.mxu1 %vm147_vm0, %v1449_v60  ;;  %v1447_v58 = vadd.f32 %v2560_v56, %v1439_v59  ;;  %v2145_v52 = vld [vmem:[%s2624_s8 + $0x8] sm:$0xff]  }
 0x5b3   :  { %v1440_v19 = vmul.f32 %v2554_v48, %v1432_v61  ;;  %v2146_v61 = vld [vmem:[%s2624_s8] sm:$0xff]  }
 0x5b5   :  { %v1448_v62 = vadd.f32 %v2560_v56, %v1440_v19 }
 0x5b7   :  { %v1450_v63 = vpack.c.bf16 %v1448_v62, %v1447_v58 }
 0x5b9   :  { %2076 = vmatmul.mubr.msk.bf16.vlgmr.msra.gmra.mxu1 %vm147_vm0, %v1450_v63 }
 0x5ba   :  { %2080 = vmatpush3.bf16.msra.mxu1 %v2141_v35 }
 0x5bb   :  { %2081 = vmatprep.subr.bf16.mxu1 %v2142_v0 }
 0x5be   :  { %2082 = vmatpush3.bf16.msra.mxu1 %v2142_v0 }
 0x5bf   :  { %2083 = vmatprep.subr.bf16.mxu1 %v2143_v1 }
 0x5c2   :  { %2084 = vmatpush3.bf16.msra.mxu1 %v2143_v1 }
 0x5c3   :  { %2085 = vmatprep.subr.bf16.mxu1 %v2144_v2 }
 0x5c6   :  { %2086 = vmatpush3.bf16.msra.mxu1 %v2144_v2 }
 0x5c7   :  { %2091 = vmatprep.subr.bf16.mxu1 %v2145_v52 }
 0x679   :  { %v2077_v3 = vpop.f32.mrf.mxu1 }
 0x67a   :  { %v1523_v10 = vadd.f32 %v2077_v3, %v1860_v5 }
 0x67b   :  { %v1514_v4 = vpop.f32.mrf.mxu1 }
 0x67c   :  { %v1515_v6 = vadd.f32 %v1860_v5, %v1514_v4  ;;  %v1531_v17 = vmax.f32 %v1523_v10, 0.0 }
 0x67d   :  { %v2078_v7 = vpop.f32.mrf.mxu1 }
 0x67e   :  { %v1526_v9 = vadd.f32 %v2078_v7, %v1860_v5  ;;  %v1529_v13 = vmax.f32 %v1515_v6, 0.0 }
 0x67f   :  { %v1517_v8 = vpop.f32.mrf.mxu1 }
 0x680   :  { %v1518_v11 = vadd.f32 %v1860_v5, %v1517_v8  ;;  %v1532_v12 = vmax.f32 %v1526_v9, 0.0 }
 0x682   :  { %v1530_v16 = vmax.f32 %v1518_v11, 0.0  ;;  %v1534_v14 = vpack.c.bf16 %v1532_v12, %v1531_v17 }
 0x684   :  { %v1533_v18 = vpack.c.bf16 %v1530_v16, %v1529_v13 }
 0x686   :  { %2087 = vmatprep.mubr.msk.bf16.mxu1 %vm1571_vm4, %v1533_v18 }
 0x687   :  { %2088 = vmatmul.mubr.msk.bf16.vlgmr.msra.gmra.mxu1 %vm1571_vm4, %v1534_v14 }
 0x688   :  { %2092 = vmatpush3.bf16.msra.mxu1 %v2145_v52 }
 0x689   :  { %2093 = vmatprep.subr.bf16.mxu1 %v2146_v61 }
 0x68c   :  { %2094 = vmatpush3.bf16.msra.mxu1 %v2146_v61 }
 0x747   :  { %v2089_v20 = vpop.f32.mrf.mxu1 }
 0x748   :  { %v1621_v26 = vadd.f32 %v2089_v20, %v1865_v22 }
 0x749   :  { %v1612_v24 = vpop.f32.mrf.mxu1 }
 0x74a   :  { %v1613_v15 = vadd.f32 %v1865_v22, %v1612_v24  ;;  %v1629_v33 = vadd.f32 %v1621_v26, %v1447_v58 }
 0x74b   :  { %v2090_v27 = vpop.f32.mrf.mxu1 }
 0x74c   :  { %v1627_v28 = vadd.f32 %v1613_v15, %v1445_v55  ;;  %v1624_v30 = vadd.f32 %v2090_v27, %v1865_v22  ;;  %v1637_v36 = vsel %vm147_vm0, %v1629_v33, 0.0 }
 0x74d   :  { %v1615_v29 = vpop.f32.mrf.mxu1 }
 0x74e   :  { %v1616_v31 = vadd.f32 %v1865_v22, %v1615_v29  ;;  %v1631_v32 = vsel %vm147_vm0, %v1627_v28, 0.0  ;;  %v1630_v23 = vadd.f32 %v1624_v30, %v1448_v62  ;;  %v1872_v29 = vld [vmem:[%s2625_s9] ss:$0 sm:$0xff] }
 0x74f   :  { %1632 = vadd.xlane.f32.xlu0 %v1631_v32 }
 0x750   :  { %v1628_v34 = vadd.f32 %v1616_v31, %v1446_v57  ;;  %v1640_v37 = vsel %vm147_vm0, %v1630_v23, 0.0 }
 0x752   :  { %v1634_v35 = vsel %vm147_vm0, %v1628_v34, 0.0 }
 0x753   :  { %1635 = vadd.xlane.f32.xlu1 %v1634_v35  ;;  %1638 = vadd.xlane.f32.xlu0 %v1637_v36 }
 0x757   :  { %1641 = vadd.xlane.f32.xlu1 %v1640_v37 }
 0x7d8   :  { %v1633_v38 = vpop.xlane.xlu0 %1632 }
 0x7d9   :  { %v1643_v39 = vmul.f32 0.03125, %v1633_v38 }
 0x7db   :  { %v1647_v46 = vsub.f32 %v1627_v28, %v1643_v39 }
 0x7dc   :  { %v1636_v40 = vpop.xlane.xlu1 %1635  ;;  %v1639_v41 = vpop.xlane.xlu0 %1638 }
 0x7dd   :  { %v1644_v43 = vmul.f32 0.03125, %v1636_v40  ;;  %v1645_v44 = vmul.f32 0.03125, %v1639_v41  ;;  %v1651_v45 = vmul.f32 %v1647_v46, %v1647_v46 }
 0x7df   :  { %v1648_v21 = vsub.f32 %v1628_v34, %v1644_v43  ;;  %v1649_v51 = vsub.f32 %v1629_v33, %v1645_v44  ;;  %v1655_v47 = vsel %vm147_vm0, %v1651_v45, 0.0 }
 0x7e0   :  { %v1642_v50 = vpop.xlane.xlu1 %1641  ;;  %1656 = vadd.xlane.f32.xlu0 %v1655_v47 }
 0x7e1   :  { %v1646_v53 = vmul.f32 0.03125, %v1642_v50  ;;  %v1652_v25 = vmul.f32 %v1648_v21, %v1648_v21  ;;  %v1653_v42 = vmul.f32 %v1649_v51, %v1649_v51 }
 0x7e3   :  { %v1650_v49 = vsub.f32 %v1630_v23, %v1646_v53  ;;  %v1658_v54 = vsel %vm147_vm0, %v1652_v25, 0.0  ;;  %v1661_v55 = vsel %vm147_vm0, %v1653_v42, 0.0 }
 0x7e4   :  { %1659 = vadd.xlane.f32.xlu1 %v1658_v54  ;;  %1662 = vadd.xlane.f32.xlu0 %v1661_v55 }
 0x7e5   :  { %v1654_v57 = vmul.f32 %v1650_v49, %v1650_v49 }
 0x7e7   :  { %v1664_v60 = vsel %vm147_vm0, %v1654_v57, 0.0 }
 0x7e8   :  { %1665 = vadd.xlane.f32.xlu1 %v1664_v60 }
 0x869   :  { %v1657_v59 = vpop.xlane.xlu0 %1656 }
 0x86a   :  { %v1667_v19 = vmul.f32 0.03125, %v1657_v59 }
 0x86c   :  { %v1671_v58 = vadd.f32 1e-05, %v1667_v19 }
 0x86d   :  { %v1660_v62 = vpop.xlane.xlu1 %1659  ;;  %v1663_v63 = vpop.xlane.xlu0 %1662 }
 0x86e   :  { %2187 = vrsqrt.f32 %v1671_v58  ;;  %v1668_v0 = vmul.f32 0.03125, %v1660_v62  ;;  %v1669_v1 = vmul.f32 0.03125, %v1663_v63 }
 0x870   :  { %v1672_v2 = vadd.f32 1e-05, %v1668_v0  ;;  %v1673_v3 = vadd.f32 1e-05, %v1669_v1 }
 0x871   :  { %v1666_v4 = vpop.xlane.xlu1 %1665 }
 0x872   :  { %2189 = vrsqrt.f32 %v1672_v2  ;;  %v1670_v5 = vmul.f32 0.03125, %v1666_v4 }
 0x873   :  { %2191 = vrsqrt.f32 %v1673_v3 }
 0x874   :  { %v1674_v7 = vadd.f32 1e-05, %v1670_v5 }
 0x876   :  { %2193 = vrsqrt.f32 %v1674_v7 }
 0x87b   :  { %v2188_v6 = vpop.eup %2187 }
 0x87c   :  { %v1679_v9 = vmul.f32 %v2188_v6, %v1647_v46 }
 0x87e   :  { %v1683_v12 = vmul.f32 %v2554_v48, %v1679_v9 }
 0x87f   :  { %v2190_v10 = vpop.eup %2189 }
 0x880   :  { %v2192_v8 = vpop.eup %2191  ;;  %v1680_v11 = vmul.f32 %v2190_v10, %v1648_v21  ;;  %v1687_v14 = vadd.f32 %v2560_v56, %v1683_v12 }
 0x881   :  { %v1681_v13 = vmul.f32 %v2192_v8, %v1649_v51 }
 0x882   :  { %v1684_v16 = vmul.f32 %v2554_v48, %v1680_v11 }
 0x883   :  { %v2194_v17 = vpop.eup %2193  ;;  %v1685_v22 = vmul.f32 %v2554_v48, %v1681_v13 }
 0x884   :  { %v1682_v18 = vmul.f32 %v2194_v17, %v1650_v49  ;;  %v1688_v20 = vadd.f32 %v2560_v56, %v1684_v16 }
 0x885   :  { %v1689_v15 = vadd.f32 %v2560_v56, %v1685_v22 }
 0x886   :  { %v1691_v24 = vpack.c.bf16 %v1688_v20, %v1687_v14  ;;  %v1686_v26 = vmul.f32 %v2554_v48, %v1682_v18 }
 0x888   :  { %2095 = vmatprep.mubr.msk.bf16.mxu1 %vm147_vm0, %v1691_v24  ;;  %v1690_v27 = vadd.f32 %v2560_v56, %v1686_v26 }
 0x88a   :  { %v1692_v28 = vpack.c.bf16 %v1690_v27, %v1689_v15 }
 0x88c   :  { %2096 = vmatmul.mubr.msk.bf16.vlgmr.msra.gmra.mxu1 %vm147_vm0, %v1692_v28 }
 0x94c   :  { %v2097_v30 = vpop.f32.mrf.mxu1 }
 0x94d   :  { %v1765_v31 = vadd.f32 %v2097_v30, %v1872_v29 }
 0x94e   :  { %v1756_v32 = vpop.f32.mrf.mxu1 }
 0x94f   :  { %1773 = vst [vmem:[#allocation2 + $0x10] sm:$0xff] %v1765_v31  ;;  %v1757_v33 = vadd.f32 %v1872_v29, %v1756_v32 }
 0x950   :  { %v2098_v34 = vpop.f32.mrf.mxu1 }
 0x951   :  { %1771 = vst [vmem:[#allocation2] sm:$0xff] %v1757_v33  ;;  %v1768_v48 = vadd.f32 %v2098_v34, %v1872_v29 }
 0x952   :  { %v1759_v35 = vpop.f32.mrf.mxu1 }
 0x953   :  { %1774 = vst [vmem:[#allocation2 + $0x18] sm:$0xff] %v1768_v48  ;;  %v1760_v56 = vadd.f32 %v1872_v29, %v1759_v35 }
 0x955   :  { %1772 = vst [vmem:[#allocation2 + $0x8] sm:$0xff] %v1760_v56 }
 0x956   :  { %2206 = shalt.err (!%p2203_p4)
}
 0x957   :  { %s2221_s9 = smov 128   ;;  %s2222_s14 = smov 8  }
 0x958   :  { %1786 = dma.vmem_to_hbm [thread:$0]  %s1781_s3, 512, %s2626_s10, [#allocation3], %s2221_s9, %s2221_s9, %s2222_s14  }
 0x959   :  { %2215 = dma.done.wait [#allocation3], 512  }
 0x95a   :  { %2216 = vsyncadd [#allocation3], 4294966784 }
 0x95b   :  { %1790 = vsyncpa [#allocation3], 1 }

</bundles_post_ra>
